<compile_context>
chip_gen: v7x
topology: tpu7x:2x2x1
jax: 0.10.0
libtpu: 0.0.40
codegen_flags: <defaults>
</compile_context>

<pallas_src>
import functools

import jax
import jax.numpy as jnp
from jax.experimental import pallas as pl
from jax.experimental.pallas import tpu as pltpu


def _round_up(x, m):
    return ((x + m - 1) // m) * m


# ---------------------------------------------------------------------------
# Fused TCN kernel (all TemporalBlocks, one (batch, time-tile) per grid step)
# ---------------------------------------------------------------------------
def _fused_tcn_kernel(*refs, cfg):
    K = cfg["K"]
    TL = cfg["TL"]
    halo = cfg["halo"]
    dilations = cfg["dilations"]
    has_ds = cfg["has_ds"]
    n_w = cfg["n_w"]

    x_hbm = refs[0]                 # (N, halo + Lp, Cpad) bf16 in HBM
    w_refs = refs[1:1 + n_w]        # per-block weights, resident in VMEM
    o_ref = refs[1 + n_w]           # (TL, Cpad) f32 output tile (batch dim squeezed)
    xbuf = refs[2 + n_w]            # (TL + halo, Cpad) bf16 VMEM scratch
    sem = refs[3 + n_w]             # DMA semaphore

    n = pl.program_id(0)
    t = pl.program_id(1)

    # Manual DMA of the halo'd (overlapping) input window for this tile.
    start = pl.multiple_of(t * TL, 8)
    cp = pltpu.make_async_copy(x_hbm.at[n, pl.ds(start, TL + halo), :], xbuf, sem)
    cp.start()
    cp.wait()

    # Activations stay f32 in VMEM; matmul operands are cast to bf16 per dot.
    h = xbuf[...].astype(jnp.float32)                     # (TL + halo, Cpad)

    wi = 0
    for b, d in enumerate(dilations):
        w1, b1, w2, b2 = w_refs[wi], w_refs[wi + 1], w_refs[wi + 2], w_refs[wi + 3]
        wi += 4
        if has_ds[b]:
            wd, bd = w_refs[wi], w_refs[wi + 1]
            wi += 2

        Lin = h.shape[0]
        ctx = (K - 1) * d

        # conv1: im2col over K causal taps -> single MXU matmul (f32 accumulation).
        L1 = Lin - ctx
        cat1 = jnp.concatenate([h[j * d:j * d + L1, :] for j in range(K)], axis=1)
        y1 = jnp.dot(cat1.astype(jnp.bfloat16), w1[...],
                     preferred_element_type=jnp.float32) + b1[...]
        y1 = jnp.maximum(y1, 0.0)

        # conv2 (same dilation).
        L2 = L1 - ctx
        cat2 = jnp.concatenate([y1[j * d:j * d + L2, :] for j in range(K)], axis=1)
        y2 = jnp.dot(cat2.astype(jnp.bfloat16), w2[...],
                     preferred_element_type=jnp.float32) + b2[...]
        y2 = jnp.maximum(y2, 0.0)

        # Residual aligned to the block's valid output rows (last L2 rows of h).
        x_res = h[Lin - L2:, :]
        if has_ds[b]:
            res = jnp.dot(x_res.astype(jnp.bfloat16), wd[...],
                          preferred_element_type=jnp.float32) + bd[...]
        else:
            res = x_res
        h = jnp.maximum(y2 + res, 0.0)

    # h has length TL + (halo - exact_context) >= TL; last TL rows are the tile output.
    o_ref[...] = h[h.shape[0] - TL:, :].astype(o_ref.dtype)


# ---------------------------------------------------------------------------
# Wrapper: pads channels to 128 lanes, time-tiles with causal halo, fuses layers
# ---------------------------------------------------------------------------
def temporal_conv_net(x_ncl, params_list, kernel_size, *, max_time_tile=512):
    """Full TCN forward.  x_ncl: (N, C, L) like PyTorch -> (N, C_last, L)."""
    N, Cin, L = x_ncl.shape
    K = kernel_size
    B = len(params_list)
    dilations = tuple(2 ** i for i in range(B))
    has_ds = tuple("wd" in p for p in params_list)
    couts = [p["b1"].shape[-1] for p in params_list]
    Cout_last = couts[-1]

    # Lane-dense channel padding (multiple of 128) shared by all layers.
    Cpad = _round_up(max([Cin] + couts), 128)

    # Total causal context needed by the fused stack (receptive field - 1),
    # rounded up to a sublane multiple.
    halo_exact = sum(2 * (K - 1) * d for d in dilations)
    halo = _round_up(halo_exact, 8)

    # Time tiling: largest multiple-of-8 tile up to max_time_tile.
    # (Sized well under the 64 MiB v7x VMEM ceiling at typical channel widths.)
    TL = min(_round_up(max_time_tile, 8), _round_up(L, 8))
    Lp = _round_up(L, TL)
    T = Lp // TL

    # Input: NCL -> NLC, zero-pad (left halo, right to Lp, channels to Cpad), bf16.
    x_nlc = jnp.transpose(x_ncl, (0, 2, 1)).astype(jnp.float32)
    x_pad = jnp.pad(x_nlc, ((0, 0), (halo, Lp - L), (0, Cpad - Cin))).astype(jnp.bfloat16)

    inputs = [x_pad]
    in_specs = [pl.BlockSpec(memory_space=pl.ANY)]   # manual halo'd DMA inside kernel
    _w2d = lambda n, t: (0, 0)                       # weights: constant block index

    cin_b = Cin
    for b, p in enumerate(params_list):
        cout_b = couts[b]
        # conv weights: zero-pad to (K, Cpad, Cpad), flatten tap-major -> (K*Cpad, Cpad), bf16.
        w1 = jnp.zeros((K, Cpad, Cpad), jnp.float32).at[:, :cin_b, :cout_b].set(p["w1"])
        w2 = jnp.zeros((K, Cpad, Cpad), jnp.float32).at[:, :cout_b, :cout_b].set(p["w2"])
        b1 = jnp.zeros((1, Cpad), jnp.float32).at[:, :cout_b].set(p["b1"])
        b2 = jnp.zeros((1, Cpad), jnp.float32).at[:, :cout_b].set(p["b2"])

        inputs += [w1.reshape(K * Cpad, Cpad).astype(jnp.bfloat16), b1,
                   w2.reshape(K * Cpad, Cpad).astype(jnp.bfloat16), b2]
        in_specs += [pl.BlockSpec((K * Cpad, Cpad), _w2d), pl.BlockSpec((1, Cpad), _w2d),
                     pl.BlockSpec((K * Cpad, Cpad), _w2d), pl.BlockSpec((1, Cpad), _w2d)]

        if has_ds[b]:  # 1x1 downsample conv (with bias), as in the PyTorch module
            wd = jnp.zeros((Cpad, Cpad), jnp.float32).at[:cin_b, :cout_b].set(p["wd"])
            bd = jnp.zeros((1, Cpad), jnp.float32).at[:, :cout_b].set(p["bd"])
            inputs += [wd.astype(jnp.bfloat16), bd]
            in_specs += [pl.BlockSpec((Cpad, Cpad), _w2d), pl.BlockSpec((1, Cpad), _w2d)]
        cin_b = cout_b

    n_w = len(inputs) - 1
    cfg = dict(K=K, TL=TL, halo=halo, dilations=dilations, has_ds=has_ds, n_w=n_w)
    kernel = functools.partial(_fused_tcn_kernel, cfg=cfg)

    # Advisory cost estimate for XLA's scheduler.
    flops = 0
    lin = TL + halo
    for b, d in enumerate(dilations):
        ctx = (K - 1) * d
        l1 = lin - ctx
        l2 = l1 - ctx
        flops += 2 * l1 * (K * Cpad) * Cpad + 2 * l2 * (K * Cpad) * Cpad
        if has_ds[b]:
            flops += 2 * l2 * Cpad * Cpad
        lin = l2
    flops *= N * T
    bytes_accessed = (x_pad.size * 2 + N * Lp * Cpad * 4
                      + sum(int(a.size) * a.dtype.itemsize for a in inputs[1:]))

    out = pl.pallas_call(
        kernel,
        out_shape=jax.ShapeDtypeStruct((N, Lp, Cpad), jnp.float32),
        grid=(N, T),
        in_specs=in_specs,
        out_specs=pl.BlockSpec((None, TL, Cpad), lambda n, t: (n, t, 0)),
        scratch_shapes=[
            pltpu.VMEM((TL + halo, Cpad), jnp.bfloat16),
            pltpu.SemaphoreType.DMA,
        ],
        compiler_params=pltpu.CompilerParams(
            dimension_semantics=("parallel", "parallel")),
        cost_estimate=pl.CostEstimate(
            flops=int(flops), transcendentals=0, bytes_accessed=int(bytes_accessed)),
    )(*inputs)

    # Strip channel/time padding, back to PyTorch NCL layout.
    return jnp.transpose(out[:, :L, :Cout_last], (0, 2, 1))


# ---------------------------------------------------------------------------
# Parameter init (effective weights; weight_norm folded in)
# ---------------------------------------------------------------------------
def init_params(key, num_inputs, num_channels, kernel_size):
    params = []
    cin = num_inputs
    for cout in num_channels:
        key, k1, k2, k3, k4, k5, k6 = jax.random.split(key, 7)
        p = {
            "w1": 0.01 * jax.random.normal(k1, (kernel_size, cin, cout), jnp.float32),
            "b1": 0.01 * jax.random.normal(k2, (1, cout), jnp.float32),
            "w2": 0.01 * jax.random.normal(k3, (kernel_size, cout, cout), jnp.float32),
            "b2": 0.01 * jax.random.normal(k4, (1, cout), jnp.float32),
        }
        if cin != cout:  # downsample 1x1 conv (with bias), as in the PyTorch module
            p["wd"] = 0.01 * jax.random.normal(k5, (cin, cout), jnp.float32)
            p["bd"] = 0.01 * jax.random.normal(k6, (1, cout), jnp.float32)
        params.append(p)
        cin = cout
    return params


# ---------------------------------------------------------------------------
# Pure-JAX reference (mirrors the PyTorch conv+chomp semantics, f32)
# ---------------------------------------------------------------------------
def reference_tcn(x_ncl, params_list, kernel_size):
    h = x_ncl
    for i, p in enumerate(params_list):
        d = 2 ** i
        pad = (kernel_size - 1) * d
        L = h.shape[-1]

        def conv(z, w_kio, b):
            w_oik = jnp.transpose(w_kio, (2, 1, 0))  # (Cout, Cin, K)
            y = jax.lax.conv_general_dilated(
                z, w_oik, window_strides=(1,), padding=[(pad, pad)],
                rhs_dilation=(d,), dimension_numbers=("NCH", "OIH", "NCH"))
            return y[:, :, :L] + b[0][None, :, None]  # chomp + bias

        out = jax.nn.relu(conv(h, p["w1"], p["b1"]))
        out = jax.nn.relu(conv(out, p["w2"], p["b2"]))
        if "wd" in p:
            res = jnp.einsum("ncl,co->nol", h, p["wd"]) + p["bd"][0][None, :, None]
        else:
            res = h
        h = jax.nn.relu(out + res)
    return h


if __name__ == "__main__":
    N, C_IN, L = 2, 4, 16
    NUM_CHANNELS = [8, 8]
    KSIZE = 2

    key = jax.random.PRNGKey(0)
    key, kx = jax.random.split(key)
    x = jax.random.normal(kx, (N, C_IN, L), jnp.float32)   # NCL, like PyTorch
    params = init_params(key, C_IN, NUM_CHANNELS, KSIZE)

    out = jax.block_until_ready(temporal_conv_net(x, params, KSIZE))
    ref = jax.block_until_ready(reference_tcn(x, params, KSIZE))

    assert out.shape == (N, NUM_CHANNELS[-1], L), out.shape
    max_err = float(jnp.max(jnp.abs(out - ref)))
    # bf16 matmul operands / f32 accumulation vs f32 reference.
    assert max_err < 5e-3, f"mismatch vs reference: {max_err}"

    print("KERNEL_OK")
</pallas_src>

<mosaic_0001>
module attributes {stable_mosaic.version = 11 : i64} {
  func.func @_fused_tcn_kernel(%arg0: i32, %arg1: i32, %arg2: memref<2x24x128xbf16, #tpu.memory_space<any>>, %arg3: memref<256x128xbf16, #tpu.memory_space<vmem>>, %arg4: memref<1x128xf32, #tpu.memory_space<vmem>>, %arg5: memref<256x128xbf16, #tpu.memory_space<vmem>>, %arg6: memref<1x128xf32, #tpu.memory_space<vmem>>, %arg7: memref<128x128xbf16, #tpu.memory_space<vmem>>, %arg8: memref<1x128xf32, #tpu.memory_space<vmem>>, %arg9: memref<256x128xbf16, #tpu.memory_space<vmem>>, %arg10: memref<1x128xf32, #tpu.memory_space<vmem>>, %arg11: memref<256x128xbf16, #tpu.memory_space<vmem>>, %arg12: memref<1x128xf32, #tpu.memory_space<vmem>>, %arg13: memref<1x16x128xf32, #tpu.memory_space<vmem>>, %arg14: memref<24x128xbf16, #tpu.memory_space<vmem>>, %arg15: memref<!tpu.dma_semaphore, #tpu.memory_space<semaphore_mem>>) attributes {dimension_semantics = [#tpu.dimension_semantics<parallel>, #tpu.dimension_semantics<parallel>], iteration_bounds = array<i64: 2, 1>, scalar_prefetch = 0 : i64, scratch_operands = 2 : i64, tpu.core_type = #tpu.core_type<tc>, window_params = [{}, {pipeline_mode = #tpu.pipeline_mode<synchronous>, transform_indices = @transform_1, window_bounds = array<i64: 256, 128>}, {pipeline_mode = #tpu.pipeline_mode<synchronous>, transform_indices = @transform_2, window_bounds = array<i64: 1, 128>}, {pipeline_mode = #tpu.pipeline_mode<synchronous>, transform_indices = @transform_3, window_bounds = array<i64: 256, 128>}, {pipeline_mode = #tpu.pipeline_mode<synchronous>, transform_indices = @transform_4, window_bounds = array<i64: 1, 128>}, {pipeline_mode = #tpu.pipeline_mode<synchronous>, transform_indices = @transform_5, window_bounds = array<i64: 128, 128>}, {pipeline_mode = #tpu.pipeline_mode<synchronous>, transform_indices = @transform_6, window_bounds = array<i64: 1, 128>}, {pipeline_mode = #tpu.pipeline_mode<synchronous>, transform_indices = @transform_7, window_bounds = array<i64: 256, 128>}, {pipeline_mode = #tpu.pipeline_mode<synchronous>, transform_indices = @transform_8, window_bounds = array<i64: 1, 128>}, {pipeline_mode = #tpu.pipeline_mode<synchronous>, transform_indices = @transform_9, window_bounds = array<i64: 256, 128>}, {pipeline_mode = #tpu.pipeline_mode<synchronous>, transform_indices = @transform_10, window_bounds = array<i64: 1, 128>}, {transform_indices = @transform_11, window_bounds = array<i64: 1, 16, 128>}]} {
    %c16_i32 = arith.constant 16 : i32
    %0 = arith.muli %arg1, %c16_i32 : i32
    %1 = tpu.assume_multiple %0, 8 : i32
    %c0_i32 = arith.constant 0 : i32
    %2 = tpu.memref_slice %arg2[%arg0, %1, %c0_i32] : memref<2x24x128xbf16, #tpu.memory_space<any>> -> memref<1x24x128xbf16, #tpu.memory_space<any>>
    %3 = tpu.memref_squeeze %2 : memref<1x24x128xbf16, #tpu.memory_space<any>> -> memref<24x128xbf16, #tpu.memory_space<any>>
    tpu.enqueue_dma source(%3 : memref<24x128xbf16, #tpu.memory_space<any>>) target(%arg14 : memref<24x128xbf16, #tpu.memory_space<vmem>>) target_semaphore(%arg15 : memref<!tpu.dma_semaphore, #tpu.memory_space<semaphore_mem>>)
    %c0_i32_0 = arith.constant 0 : i32
    %4 = tpu.memref_slice %arg2[%arg0, %1, %c0_i32_0] : memref<2x24x128xbf16, #tpu.memory_space<any>> -> memref<1x24x128xbf16, #tpu.memory_space<any>>
    %5 = tpu.memref_squeeze %4 : memref<1x24x128xbf16, #tpu.memory_space<any>> -> memref<24x128xbf16, #tpu.memory_space<any>>
    tpu.wait_dma2 semaphore(%arg15 : memref<!tpu.dma_semaphore, #tpu.memory_space<semaphore_mem>>) src(%5 : memref<24x128xbf16, #tpu.memory_space<any>>) dst(%arg14 : memref<24x128xbf16, #tpu.memory_space<vmem>>)
    %c0 = arith.constant 0 : index
    %c0_1 = arith.constant 0 : index
    %6 = vector.load %arg14[%c0, %c0_1] : memref<24x128xbf16, #tpu.memory_space<vmem>>, vector<24x128xbf16>
    %7 = arith.extf %6 : vector<24x128xbf16> to vector<24x128xf32>
    %8 = vector.extract_strided_slice %7 {offsets = [0, 0], sizes = [23, 128], strides = [1, 1]} : vector<24x128xf32> to vector<23x128xf32>
    %9 = vector.extract_strided_slice %7 {offsets = [1, 0], sizes = [23, 128], strides = [1, 1]} : vector<24x128xf32> to vector<23x128xf32>
    %10 = tpu.concatenate %8, %9 in 1 : vector<23x128xf32>, vector<23x128xf32> -> vector<23x256xf32>
    %11 = arith.truncf %10 : vector<23x256xf32> to vector<23x256xbf16>
    %c0_2 = arith.constant 0 : index
    %c0_3 = arith.constant 0 : index
    %12 = vector.load %arg3[%c0_2, %c0_3] : memref<256x128xbf16, #tpu.memory_space<vmem>>, vector<256x128xbf16>
    %cst = arith.constant dense<0.000000e+00> : vector<23x128xf32>
    %13 = tpu.matmul %11, %12, %cst {dimension_numbers = #tpu.dot_dimension_numbers<[1], [0], [0], [1], [0, 0, 1, 1], [], []>} : vector<23x256xbf16>, vector<256x128xbf16>, vector<23x128xf32> -> vector<23x128xf32>
    %c0_4 = arith.constant 0 : index
    %c0_5 = arith.constant 0 : index
    %14 = vector.load %arg4[%c0_4, %c0_5] : memref<1x128xf32, #tpu.memory_space<vmem>>, vector<1x128xf32>
    %15 = vector.broadcast %14 : vector<1x128xf32> to vector<23x128xf32>
    %16 = arith.addf %13, %15 : vector<23x128xf32>
    %cst_6 = arith.constant 0.000000e+00 : f32
    %17 = vector.broadcast %cst_6 : f32 to vector<23x128xf32>
    %18 = arith.maximumf %16, %17 : vector<23x128xf32>
    %19 = vector.extract_strided_slice %18 {offsets = [0, 0], sizes = [22, 128], strides = [1, 1]} : vector<23x128xf32> to vector<22x128xf32>
    %20 = vector.extract_strided_slice %18 {offsets = [1, 0], sizes = [22, 128], strides = [1, 1]} : vector<23x128xf32> to vector<22x128xf32>
    %21 = tpu.concatenate %19, %20 in 1 : vector<22x128xf32>, vector<22x128xf32> -> vector<22x256xf32>
    %22 = arith.truncf %21 : vector<22x256xf32> to vector<22x256xbf16>
    %c0_7 = arith.constant 0 : index
    %c0_8 = arith.constant 0 : index
    %23 = vector.load %arg5[%c0_7, %c0_8] : memref<256x128xbf16, #tpu.memory_space<vmem>>, vector<256x128xbf16>
    %cst_9 = arith.constant dense<0.000000e+00> : vector<22x128xf32>
    %24 = tpu.matmul %22, %23, %cst_9 {dimension_numbers = #tpu.dot_dimension_numbers<[1], [0], [0], [1], [0, 0, 1, 1], [], []>} : vector<22x256xbf16>, vector<256x128xbf16>, vector<22x128xf32> -> vector<22x128xf32>
    %c0_10 = arith.constant 0 : index
    %c0_11 = arith.constant 0 : index
    %25 = vector.load %arg6[%c0_10, %c0_11] : memref<1x128xf32, #tpu.memory_space<vmem>>, vector<1x128xf32>
    %26 = vector.broadcast %25 : vector<1x128xf32> to vector<22x128xf32>
    %27 = arith.addf %24, %26 : vector<22x128xf32>
    %cst_12 = arith.constant 0.000000e+00 : f32
    %28 = vector.broadcast %cst_12 : f32 to vector<22x128xf32>
    %29 = arith.maximumf %27, %28 : vector<22x128xf32>
    %30 = vector.extract_strided_slice %7 {offsets = [2, 0], sizes = [22, 128], strides = [1, 1]} : vector<24x128xf32> to vector<22x128xf32>
    %31 = arith.truncf %30 : vector<22x128xf32> to vector<22x128xbf16>
    %c0_13 = arith.constant 0 : index
    %c0_14 = arith.constant 0 : index
    %32 = vector.load %arg7[%c0_13, %c0_14] : memref<128x128xbf16, #tpu.memory_space<vmem>>, vector<128x128xbf16>
    %cst_15 = arith.constant dense<0.000000e+00> : vector<22x128xf32>
    %33 = tpu.matmul %31, %32, %cst_15 {dimension_numbers = #tpu.dot_dimension_numbers<[1], [0], [0], [1], [0, 0, 1, 1], [], []>} : vector<22x128xbf16>, vector<128x128xbf16>, vector<22x128xf32> -> vector<22x128xf32>
    %c0_16 = arith.constant 0 : index
    %c0_17 = arith.constant 0 : index
    %34 = vector.load %arg8[%c0_16, %c0_17] : memref<1x128xf32, #tpu.memory_space<vmem>>, vector<1x128xf32>
    %35 = vector.broadcast %34 : vector<1x128xf32> to vector<22x128xf32>
    %36 = arith.addf %33, %35 : vector<22x128xf32>
    %37 = arith.addf %29, %36 : vector<22x128xf32>
    %cst_18 = arith.constant 0.000000e+00 : f32
    %38 = vector.broadcast %cst_18 : f32 to vector<22x128xf32>
    %39 = arith.maximumf %37, %38 : vector<22x128xf32>
    %40 = vector.extract_strided_slice %39 {offsets = [0, 0], sizes = [20, 128], strides = [1, 1]} : vector<22x128xf32> to vector<20x128xf32>
    %41 = vector.extract_strided_slice %39 {offsets = [2, 0], sizes = [20, 128], strides = [1, 1]} : vector<22x128xf32> to vector<20x128xf32>
    %42 = tpu.concatenate %40, %41 in 1 : vector<20x128xf32>, vector<20x128xf32> -> vector<20x256xf32>
    %43 = arith.truncf %42 : vector<20x256xf32> to vector<20x256xbf16>
    %c0_19 = arith.constant 0 : index
    %c0_20 = arith.constant 0 : index
    %44 = vector.load %arg9[%c0_19, %c0_20] : memref<256x128xbf16, #tpu.memory_space<vmem>>, vector<256x128xbf16>
    %cst_21 = arith.constant dense<0.000000e+00> : vector<20x128xf32>
    %45 = tpu.matmul %43, %44, %cst_21 {dimension_numbers = #tpu.dot_dimension_numbers<[1], [0], [0], [1], [0, 0, 1, 1], [], []>} : vector<20x256xbf16>, vector<256x128xbf16>, vector<20x128xf32> -> vector<20x128xf32>
    %c0_22 = arith.constant 0 : index
    %c0_23 = arith.constant 0 : index
    %46 = vector.load %arg10[%c0_22, %c0_23] : memref<1x128xf32, #tpu.memory_space<vmem>>, vector<1x128xf32>
    %47 = vector.broadcast %46 : vector<1x128xf32> to vector<20x128xf32>
    %48 = arith.addf %45, %47 : vector<20x128xf32>
    %cst_24 = arith.constant 0.000000e+00 : f32
    %49 = vector.broadcast %cst_24 : f32 to vector<20x128xf32>
    %50 = arith.maximumf %48, %49 : vector<20x128xf32>
    %51 = vector.extract_strided_slice %50 {offsets = [0, 0], sizes = [18, 128], strides = [1, 1]} : vector<20x128xf32> to vector<18x128xf32>
    %52 = vector.extract_strided_slice %50 {offsets = [2, 0], sizes = [18, 128], strides = [1, 1]} : vector<20x128xf32> to vector<18x128xf32>
    %53 = tpu.concatenate %51, %52 in 1 : vector<18x128xf32>, vector<18x128xf32> -> vector<18x256xf32>
    %54 = arith.truncf %53 : vector<18x256xf32> to vector<18x256xbf16>
    %c0_25 = arith.constant 0 : index
    %c0_26 = arith.constant 0 : index
    %55 = vector.load %arg11[%c0_25, %c0_26] : memref<256x128xbf16, #tpu.memory_space<vmem>>, vector<256x128xbf16>
    %cst_27 = arith.constant dense<0.000000e+00> : vector<18x128xf32>
    %56 = tpu.matmul %54, %55, %cst_27 {dimension_numbers = #tpu.dot_dimension_numbers<[1], [0], [0], [1], [0, 0, 1, 1], [], []>} : vector<18x256xbf16>, vector<256x128xbf16>, vector<18x128xf32> -> vector<18x128xf32>
    %c0_28 = arith.constant 0 : index
    %c0_29 = arith.constant 0 : index
    %57 = vector.load %arg12[%c0_28, %c0_29] : memref<1x128xf32, #tpu.memory_space<vmem>>, vector<1x128xf32>
    %58 = vector.broadcast %57 : vector<1x128xf32> to vector<18x128xf32>
    %59 = arith.addf %56, %58 : vector<18x128xf32>
    %cst_30 = arith.constant 0.000000e+00 : f32
    %60 = vector.broadcast %cst_30 : f32 to vector<18x128xf32>
    %61 = arith.maximumf %59, %60 : vector<18x128xf32>
    %62 = vector.extract_strided_slice %39 {offsets = [4, 0], sizes = [18, 128], strides = [1, 1]} : vector<22x128xf32> to vector<18x128xf32>
    %63 = arith.addf %61, %62 : vector<18x128xf32>
    %cst_31 = arith.constant 0.000000e+00 : f32
    %64 = vector.broadcast %cst_31 : f32 to vector<18x128xf32>
    %65 = arith.maximumf %63, %64 : vector<18x128xf32>
    %66 = vector.extract_strided_slice %65 {offsets = [2, 0], sizes = [16, 128], strides = [1, 1]} : vector<18x128xf32> to vector<16x128xf32>
    %c0_32 = arith.constant 0 : index
    %c0_33 = arith.constant 0 : index
    %c0_34 = arith.constant 0 : index
    %67 = vector.load %arg13[%c0_32, %c0_33, %c0_34] : memref<1x16x128xf32, #tpu.memory_space<vmem>>, vector<1x16x128xf32>
    %68 = vector.shape_cast %67 : vector<1x16x128xf32> to vector<16x128xf32>
    %69 = vector.shape_cast %66 : vector<16x128xf32> to vector<1x16x128xf32>
    tpu.vector_store %arg13[%c0_32, %c0_33, %c0_34], %69 {strides = array<i32>} : memref<1x16x128xf32, #tpu.memory_space<vmem>>, vector<1x16x128xf32>,
    return
  }
  func.func @transform_1(%arg0: i32, %arg1: i32) -> (i32, i32) {
    %c0_i32 = arith.constant 0 : i32
    %c0_i32_0 = arith.constant 0 : i32
    %c0_i32_1 = arith.constant 0 : i32
    return %c0_i32, %c0_i32_0 : i32, i32
  }
  func.func @transform_2(%arg0: i32, %arg1: i32) -> (i32, i32) {
    %c0_i32 = arith.constant 0 : i32
    %c0_i32_0 = arith.constant 0 : i32
    %c0_i32_1 = arith.constant 0 : i32
    return %c0_i32, %c0_i32_0 : i32, i32
  }
  func.func @transform_3(%arg0: i32, %arg1: i32) -> (i32, i32) {
    %c0_i32 = arith.constant 0 : i32
    %c0_i32_0 = arith.constant 0 : i32
    %c0_i32_1 = arith.constant 0 : i32
    return %c0_i32, %c0_i32_0 : i32, i32
  }
  func.func @transform_4(%arg0: i32, %arg1: i32) -> (i32, i32) {
    %c0_i32 = arith.constant 0 : i32
    %c0_i32_0 = arith.constant 0 : i32
    %c0_i32_1 = arith.constant 0 : i32
    return %c0_i32, %c0_i32_0 : i32, i32
  }
  func.func @transform_5(%arg0: i32, %arg1: i32) -> (i32, i32) {
    %c0_i32 = arith.constant 0 : i32
    %c0_i32_0 = arith.constant 0 : i32
    %c0_i32_1 = arith.constant 0 : i32
    return %c0_i32, %c0_i32_0 : i32, i32
  }
  func.func @transform_6(%arg0: i32, %arg1: i32) -> (i32, i32) {
    %c0_i32 = arith.constant 0 : i32
    %c0_i32_0 = arith.constant 0 : i32
    %c0_i32_1 = arith.constant 0 : i32
    return %c0_i32, %c0_i32_0 : i32, i32
  }
  func.func @transform_7(%arg0: i32, %arg1: i32) -> (i32, i32) {
    %c0_i32 = arith.constant 0 : i32
    %c0_i32_0 = arith.constant 0 : i32
    %c0_i32_1 = arith.constant 0 : i32
    return %c0_i32, %c0_i32_0 : i32, i32
  }
  func.func @transform_8(%arg0: i32, %arg1: i32) -> (i32, i32) {
    %c0_i32 = arith.constant 0 : i32
    %c0_i32_0 = arith.constant 0 : i32
    %c0_i32_1 = arith.constant 0 : i32
    return %c0_i32, %c0_i32_0 : i32, i32
  }
  func.func @transform_9(%arg0: i32, %arg1: i32) -> (i32, i32) {
    %c0_i32 = arith.constant 0 : i32
    %c0_i32_0 = arith.constant 0 : i32
    %c0_i32_1 = arith.constant 0 : i32
    return %c0_i32, %c0_i32_0 : i32, i32
  }
  func.func @transform_10(%arg0: i32, %arg1: i32) -> (i32, i32) {
    %c0_i32 = arith.constant 0 : i32
    %c0_i32_0 = arith.constant 0 : i32
    %c0_i32_1 = arith.constant 0 : i32
    return %c0_i32, %c0_i32_0 : i32, i32
  }
  func.func @transform_11(%arg0: i32, %arg1: i32) -> (i32, i32, i32) {
    %c0_i32 = arith.constant 0 : i32
    %c0_i32_0 = arith.constant 0 : i32
    return %arg0, %arg1, %c0_i32 : i32, i32, i32
  }
}

</mosaic_0001>

<bundles_post_ra>
// kernel: tpu_custom_call.1
= control target key start
LH: loop header
LB: loop body
LE: loop exit
PB: predicated region body
PF: predicated region fallthrough
CT: control target
= control target key end

     0   :  { %s2650_s0 = inlined_call_operand.hbm [shape: bf16[2,24,128], index: 0, kind: input, shape index: {}]   ;;  %s2651_s1 = inlined_call_operand.hbm [shape: bf16[256,128], index: 1, kind: input, shape index: {}]   ;;  %s2652_s2 = inlined_call_operand.vmem [shape: f32[1,128], index: 2, kind: input, shape index: {}]   ;;  %s2653_s3 = inlined_call_operand.hbm [shape: bf16[256,128], index: 3, kind: input, shape index: {}]   ;;  %s2654_s4 = inlined_call_operand.vmem [shape: f32[1,128], index: 4, kind: input, shape index: {}]   ;;  %s2655_s5 = inlined_call_operand.hbm [shape: bf16[128,128], index: 5, kind: input, shape index: {}]   ;;  %s2656_s6 = inlined_call_operand.vmem [shape: f32[1,128], index: 6, kind: input, shape index: {}]   ;;  %s2657_s7 = inlined_call_operand.hbm [shape: bf16[256,128], index: 7, kind: input, shape index: {}]   ;;  %s2658_s8 = inlined_call_operand.vmem [shape: f32[1,128], index: 8, kind: input, shape index: {}]   ;;  %s2659_s9 = inlined_call_operand.hbm [shape: bf16[256,128], index: 9, kind: input, shape index: {}]   ;;  %s2660_s10 = inlined_call_operand.vmem [shape: f32[1,128], index: 10, kind: input, shape index: {}]   ;;  %s2661_s11 = inlined_call_operand.hbm [shape: f32[2,16,128], index: 11, kind: output, shape index: {}]  }
   0x1   :  { %2676 = sst [smem:[#allocation31_spill]] %s2653_s3 }
   0x2   :  { %2677 = sst [smem:[#allocation32_spill]] %s2661_s11 }
   0x3   :  { %16 = vsyncpa [#allocation5], 0 }
   0x4   :  { %17 = vsyncpa [#allocation8], 0 }
   0x5   :  { %18 = vsyncpa [#allocation11], 0 }
   0x6   :  { %19 = vsyncpa [#allocation6], 0 }
   0x7   :  { %21 = vsyncpa [#allocation6 + $0x1], 0  ;;  %s2326_s17 = smov 0   ;;  %s2328_s18 = smov 0  }
   0x8   :  { %s2330_s19 = smov 0   ;;  %s2332_s20 = smov 0  }
   0x9   :  { %s2334_s21 = smov 0   ;;  %s2336_s22 = smov 0  }
   0xa LB: > { %2678 = sst [smem:[#allocation23_spill]] %s2233_s17  ;;  %s1550_s23 = sadd.s32 4294967295, %s2253_s22   ;;  %s2253_s22 = sphi %s2336_s22, %s27_s22   ;;  %s2249_s21 = sphi %s2334_s21, %s2705_s21   ;;  %s2245_s20 = sphi %s2332_s20, %s2704_s20   ;;  %s2241_s19 = sphi %s2330_s19, %s2703_s19   ;;  %s2237_s18 = sphi %s2328_s18, %s2707_s18   ;;  %s2233_s17 = sphi %s2326_s17, %s2706_s17  }
   0xb   : > { %2679 = sst [smem:[#allocation24_spill]] %s2241_s19  ;;  %s1551_s24 = sadd.s32 4294967294, %s2253_s22  }
   0xc   : > { %2680 = sst [smem:[#allocation25_spill]] %s2249_s21  ;;  %s39_s25 = sadd.s32 1, %s2249_s21 }
   0xd   : > { %2681 = sst [smem:[#allocation26_spill]] %s2253_s22  ;;  %s258_s26 = sadd.s32 1, %s2241_s19 }
   0xe   : > { %p41_p0 = scmp.ge.s32.totalorder %s39_s25, 2  ;;  %p268_p1 = scmp.ne.s32.totalorder %s2241_s19, %s2237_s18 }
   0xf   : > { %p269_p2 = scmp.eq.s32.totalorder %s1550_s23, 1  ;;  %p274_p3 = scmp.ne.s32.totalorder %s2237_s18, %s2233_s17 }
  0x10   : > { %s2709_s25 = smov (%p41_p0, %s39_s25), 0  ;;  %p275_p5 = scmp.eq.s32.totalorder %s1551_s24, 1 }
  0x11   : > { %2682 = sst [smem:[#allocation27_spill]] %s2709_s25  ;;  %p2366_p4 = por %p269_p2, %p268_p1 }
  0x12   : > { %s253_s28 = ssub.s32 %s2249_s21, %s2709_s25  ;;  %p1552_p6 = scmp.ge.s32.totalorder %s2253_s22, 1 }
  0x13   : > { %s2683_s27 = scalar_select %p2366_p4, 1, 0 }
  0x14   : > { %p256_p7 = scmp.eq.s32.totalorder %s253_s28, 0  ;;  %p2373_p8 = por %p275_p5, %p274_p3 }
  0x15   : > { %2684 = sst [smem:[#allocation28_spill]] %s2683_s27  ;;  %p282_p9 = scmp.lt.s32.totalorder %s2253_s22, 3 }
  0x16   : > { %s2685_s29 = scalar_select %p2373_p8, 1, 0 }
  0x17   : > { %s2379_s30 = scalar_select %p256_p7, %s2241_s19, %s258_s26  }
  0x18   : > { %2686 = sst [smem:[#allocation29_spill]] %s2685_s29  ;;  %p2381_p10 = pnand %p1552_p6, %p282_p9 }
  0x19   : > { %2687 = sst [smem:[#allocation30_spill]] %s2379_s30  ;;  %p2385_p11 = scmp.eq.s32.totalorder %s1550_s23, 0 }
  0x1a   : > { %s2688_s12 = scalar_select %p2381_p10, 1, 0 }
  0x1b   : > { %s2689_s13 = scalar_select %p2385_p11, 1, 0 }
  0x1c   : > { %p1833_p12 = pneg %p2381_p10  ;;  %s2255_s14 = smov [#allocation7]  }
  0x1d   : > { %s310_s15 = sshll.u32 %s2255_s14, 4  ;;  %s2256_s24 = smov [#allocation10]   ;;  %s311_s15 = int_to_ptr.vmem [resolvable:$true] %s310_s15 }
  0x1e   : > { %p2393_p13 = pnand %p2385_p11, %p1833_p12  ;;  %s342_s26 = sshll.u32 %s2256_s24, 4  ;;  %s2397_s26 = int_to_ptr.vmem [resolvable:$true] %s342_s26 }
  0x1f   : > { %s2691_s3 = sld [smem:[#allocation31_spill]] }
  0x20   : > { %p2407_p1 = pneg %p2393_p13 }
  0x25   : > { %s1997_s25 = scalar_lea.hbm %s2691_s3, 2048 }
  0x26   : > { %p1998_p0 = scmp.ne.s32.totalorder %s2691_s3, %s1997_s25  ;;  %p2004_p5 = scmp.lt.u32.totalorder %s1997_s25, %s2691_s3 }
  0x28   : > { %p2000_p2 = pnand %p2407_p1, %p1998_p0 }
  0x2a   : > { %p2001_p3 = pneg %p2000_p2 }
  0x2c   : > { %p2006_p6 = pnand %p2004_p5, %p2001_p3 }
  0x2e   : > { %2009 = shalt.err (!%p2006_p6)
}
  0x2f   : > { %s2010_s23 = scalar_lea.vmem %s311_s15, 2048  ;;  %p2018_p8 = scmp.lt.s32.totalorder %s311_s15, %s311_s15 }
  0x30   : > { %p2011_p7 = scmp.ne.s32.totalorder %s311_s15, %s2010_s23  ;;  %p2019_p4 = scmp.lt.s32.totalorder %s2010_s23, %s2010_s23 }
  0x32   : > { %p2013_p9 = pnand %p2011_p7, %p2407_p1  ;;  %p2020_p11 = por %p2019_p4, %p2018_p8 }
  0x34   : > { %p2014_p12 = pneg %p2013_p9 }
  0x36   : > { %p2021_p10 = pnand %p2020_p11, %p2014_p12 }
  0x38   : > { %2024 = shalt.err (!%p2021_p10)
}
  0x39   : > { %s2257_s21 = smov 64   ;;  %s2258_s30 = smov 4  }
  0x3a   : > { %1839 = dma.hbm_to_vmem [thread:$0]  (!%p2393_p13), %s2691_s3, 2048, %s311_s15, [#allocation8], %s2257_s21, %s2257_s21, %s2258_s30  }
  0x3b   : > { %s2025_s29 = scalar_lea.hbm %s2657_s7, 2048 }
  0x3c   : > { %p2026_p4 = scmp.ne.s32.totalorder %s2657_s7, %s2025_s29  ;;  %p2032_p11 = scmp.lt.u32.totalorder %s2025_s29, %s2657_s7 }
  0x3e   : > { %p2028_p8 = pnand %p2026_p4, %p2407_p1 }
  0x40   : > { %p2029_p10 = pneg %p2028_p8 }
  0x42   : > { %p2034_p0 = pnand %p2032_p11, %p2029_p10 }
  0x44   : > { %2037 = shalt.err (!%p2034_p0)
}
  0x45   : > { %s2038_s15 = scalar_lea.vmem %s2397_s26, 2048  ;;  %p2046_p6 = scmp.lt.s32.totalorder %s2397_s26, %s2397_s26 }
  0x46   : > { %p2039_p2 = scmp.ne.s32.totalorder %s2397_s26, %s2038_s15  ;;  %p2047_p7 = scmp.lt.s32.totalorder %s2038_s15, %s2038_s15 }
  0x48   : > { %p2041_p3 = pnand %p2039_p2, %p2407_p1  ;;  %p2048_p9 = por %p2047_p7, %p2046_p6 }
  0x4a   : > { %p2042_p5 = pneg %p2041_p3 }
  0x4c   : > { %p2049_p12 = pnand %p2048_p9, %p2042_p5 }
  0x4e   : > { %2052 = shalt.err (!%p2049_p12)
}
  0x4f   : > { %1845 = dma.hbm_to_vmem [thread:$0]  (!%p2393_p13), %s2657_s7, 2048, %s2397_s26, [#allocation11], %s2257_s21, %s2257_s21, %s2258_s30  }
  0x50   : > { %s2259_s22 = smov [#allocation4]   ;;  %s2260_s19 = smov [#allocation9]  }
  0x51   : > { %s294_s29 = sshll.u32 %s2259_s22, 4  ;;  %s326_s25 = sshll.u32 %s2260_s19, 4  ;;  %s295_s29 = int_to_ptr.vmem [resolvable:$true] %s294_s29  ;;  %s327_s25 = int_to_ptr.vmem [resolvable:$true] %s326_s25 }
  0x52   : > { %s2053_s23 = scalar_lea.hbm %s2651_s1, 2048 }
  0x53   : > { %p2054_p4 = scmp.ne.s32.totalorder %s2651_s1, %s2053_s23  ;;  %p2060_p11 = scmp.lt.u32.totalorder %s2053_s23, %s2651_s1 }
  0x55   : > { %p2056_p8 = pnand %p2054_p4, %p2407_p1 }
  0x57   : > { %p2057_p10 = pneg %p2056_p8 }
  0x59   : > { %p2062_p0 = pnand %p2060_p11, %p2057_p10 }
  0x5b   : > { %2065 = shalt.err (!%p2062_p0)
}
  0x5c   : > { %s2066_s26 = scalar_lea.vmem %s295_s29, 2048  ;;  %p2074_p6 = scmp.lt.s32.totalorder %s295_s29, %s295_s29 }
  0x5d   : > { %p2067_p2 = scmp.ne.s32.totalorder %s295_s29, %s2066_s26  ;;  %p2075_p7 = scmp.lt.s32.totalorder %s2066_s26, %s2066_s26 }
  0x5f   : > { %p2069_p3 = pnand %p2067_p2, %p2407_p1  ;;  %p2076_p9 = por %p2075_p7, %p2074_p6 }
  0x61   : > { %p2070_p5 = pneg %p2069_p3 }
  0x63   : > { %p2077_p12 = pnand %p2076_p9, %p2070_p5 }
  0x65   : > { %2080 = shalt.err (!%p2077_p12)
}
  0x66   : > { %1836 = dma.hbm_to_vmem [thread:$0]  (!%p2393_p13), %s2651_s1, 2048, %s295_s29, [#allocation5], %s2257_s21, %s2257_s21, %s2258_s30  }
  0x67   : > { %s2081_s19 = scalar_lea.hbm %s2655_s5, 1024 }
  0x68   : > { %p2082_p4 = scmp.ne.s32.totalorder %s2655_s5, %s2081_s19  ;;  %p2088_p11 = scmp.lt.u32.totalorder %s2081_s19, %s2655_s5 }
  0x6a   : > { %p2084_p8 = pnand %p2082_p4, %p2407_p1 }
  0x6c   : > { %p2085_p10 = pneg %p2084_p8 }
  0x6e   : > { %p2090_p0 = pnand %p2088_p11, %p2085_p10 }
  0x70   : > { %2093 = shalt.err (!%p2090_p0)
}
  0x71   : > { %s2094_s11 = scalar_lea.vmem %s327_s25, 1024  ;;  %p2102_p6 = scmp.lt.s32.totalorder %s327_s25, %s327_s25 }
  0x72   : > { %p2095_p2 = scmp.ne.s32.totalorder %s327_s25, %s2094_s11  ;;  %p2103_p7 = scmp.lt.s32.totalorder %s2094_s11, %s2094_s11 }
  0x74   : > { %p2097_p3 = pnand %p2095_p2, %p2407_p1  ;;  %p2104_p9 = por %p2103_p7, %p2102_p6 }
  0x76   : > { %p2098_p5 = pneg %p2097_p3 }
  0x78   : > { %p2105_p12 = pnand %p2104_p9, %p2098_p5 }
  0x7a   : > { %2108 = shalt.err (!%p2105_p12)
}
  0x7b   : > { %1842 = dma.hbm_to_vmem [thread:$0]  (!%p2393_p13), %s2655_s5, 1024, %s327_s25, [#allocation8], %s2257_s21, %s2257_s21, %s2258_s30  }
  0x7c   : > { %s2261_s3 = smov [#allocation12]   ;;  %s2109_s19 = scalar_lea.hbm %s2659_s9, 2048 }
  0x7d   : > { %s358_s27 = sshll.u32 %s2261_s3, 4  ;;  %p2110_p4 = scmp.ne.s32.totalorder %s2659_s9, %s2109_s19  ;;  %s359_s27 = int_to_ptr.vmem [resolvable:$true] %s358_s27 }
  0x7e   : > { %p2116_p11 = scmp.lt.u32.totalorder %s2109_s19, %s2659_s9 }
  0x7f   : > { %p2112_p8 = pnand %p2110_p4, %p2407_p1 }
  0x81   : > { %p2113_p10 = pneg %p2112_p8 }
  0x83   : > { %p2118_p0 = pnand %p2116_p11, %p2113_p10 }
  0x85   : > { %2121 = shalt.err (!%p2118_p0)
}
  0x86   : > { %s2122_s25 = scalar_lea.vmem %s359_s27, 2048  ;;  %p2130_p6 = scmp.lt.s32.totalorder %s359_s27, %s359_s27 }
  0x87   : > { %p2123_p2 = scmp.ne.s32.totalorder %s359_s27, %s2122_s25  ;;  %p2131_p7 = scmp.lt.s32.totalorder %s2122_s25, %s2122_s25 }
  0x89   : > { %p2125_p3 = pnand %p2123_p2, %p2407_p1  ;;  %p2132_p9 = por %p2131_p7, %p2130_p6 }
  0x8b   : > { %p2126_p5 = pneg %p2125_p3 }
  0x8d   : > { %p2133_p12 = pnand %p2132_p9, %p2126_p5 }
  0x8f   : > { %2136 = shalt.err (!%p2133_p12)
}
  0x90   : > { %1848 = dma.hbm_to_vmem [thread:$0]  (!%p2393_p13), %s2659_s9, 2048, %s359_s27, [#allocation11], %s2257_s21, %s2257_s21, %s2258_s30  }
  0x91   : > { %p2693_p4 = scmp.ne.s32.totalorder %s2688_s12, 0 }
  0x92   : > { %p2694_p1 = scmp.ne.s32.totalorder (!%p2693_p4), %s2689_s13, 0 }
  0x93   : > { %377 = sbr.rel (%p2693_p4) target bundleno = 1160 (0x488), region = 60 }
  0x9a   : > { %2214 = dma.done.wait (%p2694_p1), [#allocation5], 2048  }
  0x9b   : > { %2216 = vsyncadd (%p2694_p1), [#allocation5], 4294965248 }
  0x9c   : > { %2218 = dma.done.wait (%p2694_p1), [#allocation8], 3072  }
  0x9d   : > { %2220 = vsyncadd (%p2694_p1), [#allocation8], 4294964224 }
  0x9e   : > { %2222 = dma.done.wait (%p2694_p1), [#allocation11], 4096  }
  0x9f   : > { %2224 = vsyncadd (%p2694_p1), [#allocation11], 4294963200  ;;  %s423_s12 = sand.u32 1, %s2237_s18   ;;  %s1651_s16 = smul.u32 192, %s2245_s20 }
  0xa0   : > { %s1564_s14 = sshll.u32 %s423_s12, 4  ;;  %s2262_s3 = smov [#allocation2]  }
  0xa1   : > { %s434_s26 = scalar_lea.hbm %s2650_s0, %s1651_s16  ;;  %s442_s27 = sshll.u32 %s2262_s3, 4  ;;  %s443_s27 = int_to_ptr.vmem [resolvable:$true] %s442_s27 }
  0xa2   : > { %s2137_s17 = scalar_lea.hbm %s434_s26, 192  ;;  %s2139_s13 = scalar_lea.hbm %s2650_s0, 384 }
  0xa3   : > { %p2138_p13 = scmp.ne.s32.totalorder %s434_s26, %s2137_s17  ;;  %p2140_p8 = scmp.lt.u32.totalorder %s434_s26, %s2650_s0 }
  0xa4   : > { %p2141_p10 = scmp.lt.u32.totalorder %s2139_s13, %s2137_s17  ;;  %p2143_p0 = scmp.lt.u32.totalorder %s2137_s17, %s434_s26 }
  0xa6   : > { %p2142_p11 = por %p2141_p10, %p2140_p8 }
  0xa8   : > { %p2144_p2 = por %p2143_p0, %p2142_p11 }
  0xaa   : > { %p2145_p3 = pnand %p2144_p2, %p2138_p13 }
  0xac   : > { %2148 = shalt.err (!%p2145_p3)  }
  0xad   : > { %s2149_s23 = scalar_lea.vmem %s443_s27, 192  ;;  %p2154_p6 = scmp.lt.s32.totalorder %s443_s27, %s443_s27 }
  0xae   : > { %p2150_p5 = scmp.ne.s32.totalorder %s443_s27, %s2149_s23  ;;  %p2155_p7 = scmp.lt.s32.totalorder %s2149_s23, %s2149_s23 }
  0xb0   : > { %p2156_p9 = por %p2155_p7, %p2154_p6 }
  0xb2   : > { %p2157_p12 = pnand %p2156_p9, %p2150_p5 }
  0xb4   : > { %2160 = shalt.err (!%p2157_p12)  }
  0xb5   : > { %445 = dma.hbm_to_vmem [thread:$0]  %s434_s26, 192, %s443_s27, [#allocation3] }
  0xb6   : > { %s2542_s15 = scalar_lea.vmem [#allocation13], %s1564_s14 }
  0xb7   : > { %2225 = dma.done.wait [#allocation3], 192 }
  0xb8   : > { %2226 = vsyncadd [#allocation3], 4294967104  ;;  %v1922_v0 = vld [vmem:[#allocation4 + $0x40] sm:$0xff]   ;;  %v1924_v2 = vld [vmem:[#allocation4 + $0x48] sm:$0xff]   ;;  %vm459_vm0 = vcmask 1046528   ;;  %vm995_vm1 = vcmask 1045504  }
  0xb9   : > { %v1923_v1 = vld [vmem:[#allocation4] sm:$0xff]   ;;  %1653 = vmatprep.subr.bf16.mxu0 %v1922_v0  ;;  %v1925_v3 = vld [vmem:[#allocation4 + $0x8] sm:$0xff]   ;;  %v1926_v4 = vld [vmem:[#allocation4 + $0x50] sm:$0xff]   ;;  %vm1395_vm2 = vcmask 1043456   ;;  %s2695_s17 = sld [smem:[#allocation28_spill]]  ;;  %s1652_s22 = sshll.u32 %s2245_s20, 8 }
  0xba   : > { %1654 = vmatpush3.bf16.msra.mxu0 %v1923_v1  ;;  %v1927_v5 = vld [vmem:[#allocation4 + $0x10] sm:$0xff]   ;;  %v1928_v6 = vld [vmem:[#allocation4 + $0x58] sm:$0xff]   ;;  %v1930_v8 = vld [vmem:[#allocation4 + $0x60] sm:$0xff]   ;;  %s1429_s19 = sshll.u32 %s2542_s15, 4  ;;  %s2696_s24 = sld [smem:[#allocation32_spill]]  ;;  %s2598_s19 = int_to_ptr.vmem [resolvable:$true] %s1429_s19 }
  0xbb   : > { %1655 = vmatprep.subr.bf16.mxu0 %v1924_v2  ;;  %v1929_v7 = vld [vmem:[#allocation4 + $0x18] sm:$0xff]   ;;  %v1931_v9 = vld [vmem:[#allocation4 + $0x20] sm:$0xff]   ;;  %v1932_v10 = vld [vmem:[#allocation4 + $0x68] sm:$0xff]   ;;  %s2604_s20 = scalar_lea.sflag [#allocation6], %s423_s12  ;;  %s2161_s25 = scalar_lea.vmem %s2598_s19, 256 }
  0xbc   : > { %v2544_v11 = vld [vmem:[#allocation2] sm:$0xff]   ;;  %v452_v12 = vld [vmem:[#allocation2 + $0x8] sm:$0xf]  ;;  %v1933_v13 = vld [vmem:[#allocation4 + $0x28] sm:$0xff]   ;;  %p2162_p4 = scmp.ne.s32.totalorder %s2598_s19, %s2161_s25  ;;  %s2263_s11 = smov [#allocation13]  }
  0xbd   : > { %v453_v14 = vunpack.c.l.bf16 %v2544_v11  ;;  %v454_v15 = vunpack.c.h.bf16 %v2544_v11  ;;  %v455_v16 = vunpack.c.l.bf16 %v452_v12  ;;  %v1940_v17 = vld [vmem:[#allocation7 + $0x40] sm:$0xff]   ;;  %v1934_v19 = vld [vmem:[#allocation4 + $0x70] sm:$0xff]   ;;  %v1942_v23 = vld [vmem:[#allocation7 + $0x48] sm:$0xff]   ;;  %v1567_v36 = vcombine.low %v452_v12, %v452_v12  ;;  %s2165_s29 = sshll.u32 %s2263_s11, 4  ;;  %s2166_s29 = int_to_ptr.vmem [resolvable:$false] %s2165_s29 }
  0xbe   : > { %1656 = vmatpush3.bf16.msra.mxu0 %v1925_v3  ;;  %v1941_v18 = vld [vmem:[#allocation7] sm:$0xff]   ;;  %1681 = vmatprep.subr.bf16.mxu1 %v1940_v17  ;;  %v1935_v24 = vld [vmem:[#allocation4 + $0x30] sm:$0xff]   ;;  %v1944_v28 = vld [vmem:[#allocation7 + $0x8] sm:$0xff]   ;;  %v885_v52 = vrot.slane %v2544_v11, 1  ;;  %s2167_s16 = scalar_lea.vmem %s2166_s29, 512  ;;  %p2168_p10 = scmp.lt.s32.totalorder %s2598_s19, %s2166_s29 }
  0xbf   : > { %1657 = vmatprep.subr.bf16.mxu0 %v1926_v4  ;;  %v460_v20 = vrot.slane %v453_v14, 1  ;;  %v461_v21 = vrot.slane %v454_v15, 1  ;;  %v463_v22 = vrot.slane %v455_v16, 1  ;;  %1682 = vmatpush3.bf16.msra.mxu1 %v1941_v18  ;;  %v1945_v29 = vld [vmem:[#allocation7 + $0x50] sm:$0xff]   ;;  %v1936_v30 = vld [vmem:[#allocation4 + $0x78] sm:$0xff]   ;;  %v1943_v33 = vld [vmem:[#allocation9] sm:$0xff]   ;;  %p2169_p11 = scmp.lt.s32.totalorder %s2167_s16, %s2161_s25 }
  0xc0   : > { %1683 = vmatprep.subr.bf16.mxu1 %v1942_v23  ;;  %v1937_v31 = vld [vmem:[#allocation4 + $0x38] sm:$0xff]   ;;  %v1947_v32 = vld [vmem:[#allocation7 + $0x10] sm:$0xff]   ;;  %v1946_v34 = vld [vmem:[#allocation9 + $0x8] sm:$0xff]   ;;  %v886_v53 = vrot.slane %v1567_v36, 1  ;;  %s2596_s23 = scalar_lea.hbm %s2696_s24, %s1652_s22  ;;  %p2697_p1 = scmp.ne.s32.totalorder %s2695_s17, 0 }
  0xc1   : > { %v462_v25 = vsel %vm459_vm0, %v460_v20, %v461_v21  ;;  %v464_v26 = vsel %vm459_vm0, %v461_v21, %v463_v22  ;;  %v471_v35 = vpack.c.bf16 %v463_v22, %v463_v22  ;;  %v1948_v37 = vld [vmem:[#allocation7 + $0x58] sm:$0xff]   ;;  %v1949_v38 = vld [vmem:[#allocation9 + $0x10] sm:$0xff]   ;;  %v1951_v40 = vld [vmem:[#allocation7 + $0x60] sm:$0xff]   ;;  %p2170_p0 = por %p2169_p11, %p2168_p10 }
  0xc2   : > { %1658 = vmatpush3.bf16.msra.mxu0 %v1927_v5  ;;  %v469_v27 = vpack.c.bf16 %v464_v26, %v462_v25  ;;  %v1950_v39 = vld [vmem:[#allocation7 + $0x18] sm:$0xff]   ;;  %v1953_v42 = vld [vmem:[#allocation7 + $0x20] sm:$0xff]   ;;  %v1954_v43 = vld [vmem:[#allocation7 + $0x68] sm:$0xff]   ;;  %v887_v55 = vsel %vm459_vm0, %v885_v52, %v886_v53  ;;  %p2163_p13 = pnand %p2162_p4, %p2697_p1 }
  0xc3   : > { %1659 = vmatprep.subr.bf16.mxu0 %v1928_v6  ;;  %1684 = vmatpush3.bf16.msra.mxu1 %v1944_v28  ;;  %v1952_v41 = vld [vmem:[#allocation9 + $0x18] sm:$0xff]   ;;  %v1955_v44 = vld [vmem:[#allocation9 + $0x20] sm:$0xff]   ;;  %v1956_v45 = vld [vmem:[#allocation7 + $0x28] sm:$0xff]  }
  0xc4   : > { %639 = vmatprep.mubr.bf16.mxu0 %v469_v27  ;;  %1685 = vmatprep.subr.bf16.mxu1 %v1945_v29  ;;  %v1957_v46 = vld [vmem:[#allocation7 + $0x70] sm:$0xff]   ;;  %v1958_v47 = vld [vmem:[#allocation9 + $0x28] sm:$0xff]   ;;  %v1960_v49 = vld [vmem:[#allocation7 + $0x78] sm:$0xff]   ;;  %p2164_p8 = pneg %p2163_p13 }
  0xc5   : > { %v1959_v48 = vld [vmem:[#allocation7 + $0x30] sm:$0xff]   ;;  %v1962_v51 = vld [vmem:[#allocation7 + $0x38] sm:$0xff]   ;;  %v1964_v56 = vld [vmem:[#allocation10 + $0x40] sm:$0xff]  }
  0xc6   : > { %1660 = vmatpush3.bf16.msra.mxu0 %v1929_v7  ;;  %v1961_v50 = vld [vmem:[#allocation9 + $0x30] sm:$0xff]   ;;  %v1963_v54 = vld [vmem:[#allocation9 + $0x38] sm:$0xff]   ;;  %v1965_v18 = vld [vmem:[#allocation10] sm:$0xff]   ;;  %p2171_p2 = pnand %p2170_p0, %p2164_p8 }
  0xc7   : > { %1661 = vmatprep.subr.bf16.mxu0 %v1930_v8  ;;  %1686 = vmatpush3.bf16.msra.mxu1 %v1947_v32  ;;  %v1568_v58 = vld [vmem:[%s2652_s2] ss:$0 sm:$0xff]  ;;  %v1967_v21 = vld [vmem:[#allocation10 + $0x8] sm:$0xff]   ;;  %v1970_v26 = vld [vmem:[#allocation10 + $0x58] sm:$0xff]  }
  0xc8   : > { %1687 = vmatprep.subr.bf16.mxu1 %v1948_v37  ;;  %v1968_v23 = vld [vmem:[#allocation10 + $0x50] sm:$0xff]   ;;  %v1971_v28 = vld [vmem:[#allocation10 + $0x18] sm:$0xff]   ;;  %v1973_v32 = vld [vmem:[#allocation10 + $0x20] sm:$0xff]  }
  0xc9   : > { %v1978_v37 = vld [vmem:[#allocation10 + $0x78] sm:$0xff]  }
  0xca   : > { %1662 = vmatpush3.bf16.msra.mxu0 %v1931_v9 }
  0xcb   : > { %1663 = vmatprep.subr.bf16.mxu0 %v1932_v10  ;;  %1688 = vmatpush3.bf16.msra.mxu1 %v1950_v39  ;;  %v1980_v39 = vld [vmem:[#allocation12 + $0x40] sm:$0xff]  }
  0xcc   : > { %1689 = vmatprep.subr.bf16.mxu1 %v1951_v40  ;;  %v1981_v40 = vld [vmem:[#allocation12] sm:$0xff]  }
  0xce   : > { %1664 = vmatpush3.bf16.msra.mxu0 %v1933_v13 }
  0xcf   : > { %1665 = vmatprep.subr.bf16.mxu0 %v1934_v19  ;;  %1690 = vmatpush3.bf16.msra.mxu1 %v1953_v42  ;;  %v1966_v19 = vld [vmem:[#allocation10 + $0x48] sm:$0xff]  }
  0xd0   : > { %1691 = vmatprep.subr.bf16.mxu1 %v1954_v43  ;;  %v1983_v42 = vld [vmem:[#allocation12 + $0x8] sm:$0xff]   ;;  %v1984_v43 = vld [vmem:[#allocation12 + $0x50] sm:$0xff]  }
  0xd2   : > { %1666 = vmatpush3.bf16.msra.mxu0 %v1935_v24  ;;  %v1969_v24 = vld [vmem:[#allocation10 + $0x10] sm:$0xff]  }
  0xd3   : > { %1667 = vmatprep.subr.bf16.mxu0 %v1936_v30  ;;  %1692 = vmatpush3.bf16.msra.mxu1 %v1956_v45 }
  0xd4   : > { %1693 = vmatprep.subr.bf16.mxu1 %v1957_v46  ;;  %v1585_v46 = vld [vmem:[%s2654_s4] ss:$0 sm:$0xff] }
  0xd6   : > { %1668 = vmatpush3.bf16.msra.mxu0 %v1937_v31  ;;  %v1972_v31 = vld [vmem:[#allocation10 + $0x60] sm:$0xff]  }
  0xd7   : > { %1775 = vmatprep.subr.bf16.mxu0 %v1943_v33  ;;  %1694 = vmatpush3.bf16.msra.mxu1 %v1959_v48  ;;  %v1602_v48 = vld [vmem:[%s2656_s6] ss:$0 sm:$0xff] }
  0xd8   : > { %1695 = vmatprep.subr.bf16.mxu1 %v1960_v49 }
  0xd9   : > { %640 = vmatmul.mubr.bf16.vlgmr.msra.gmra.mrb[0].mxu0 %v2544_v11 }
  0xda   : > { %647 = vmatprep.mubr.bf16.mxu0 %v471_v35  ;;  %1776 = vmatpush3.bf16.msra.mxu0 %v1943_v33  ;;  %v1974_v33 = vld [vmem:[#allocation10 + $0x68] sm:$0xff]   ;;  %v1976_v35 = vld [vmem:[#allocation10 + $0x70] sm:$0xff]  }
  0xdb   : > { %1777 = vmatprep.subr.bf16.mxu0 %v1946_v34  ;;  %1696 = vmatpush3.bf16.msra.mxu1 %v1962_v51 }
  0xdc   : > { %1719 = vmatprep.subr.bf16.mxu1 %v1964_v56 }
  0xde   : > { %1778 = vmatpush3.bf16.msra.mxu0 %v1946_v34  ;;  %v1975_v34 = vld [vmem:[#allocation10 + $0x28] sm:$0xff]  }
  0xdf   : > { %1779 = vmatprep.subr.bf16.mxu0 %v1949_v38 }
  0xe1   : > { %648 = vmatmul.mubr.bf16.gmra.mrb[4].mxu0 %v1567_v36  ;;  %v1977_v36 = vld [vmem:[#allocation10 + $0x30] sm:$0xff]  }
  0xe2   : > { %1780 = vmatpush3.bf16.msra.mxu0 %v1949_v38  ;;  %1791 = vmatprep.mubr.bf16.mxu0 %v887_v55  ;;  %v1979_v38 = vld [vmem:[#allocation10 + $0x38] sm:$0xff]  }
  0xe3   : > { %1781 = vmatprep.subr.bf16.mxu0 %v1952_v41 }
  0xe6   : > { %1782 = vmatpush3.bf16.msra.mxu0 %v1952_v41  ;;  %v1982_v41 = vld [vmem:[#allocation12 + $0x48] sm:$0xff]  }
  0xe7   : > { %1783 = vmatprep.subr.bf16.mxu0 %v1955_v44 }
  0xea   : > { %1784 = vmatpush3.bf16.msra.mxu0 %v1955_v44  ;;  %v1985_v44 = vld [vmem:[#allocation12 + $0x10] sm:$0xff]  }
  0xeb   : > { %1785 = vmatprep.subr.bf16.mxu0 %v1958_v47 }
  0xee   : > { %1786 = vmatpush3.bf16.msra.mxu0 %v1958_v47 }
  0xef   : > { %1787 = vmatprep.subr.bf16.mxu0 %v1961_v50 }
  0xf2   : > { %1788 = vmatpush3.bf16.msra.mxu0 %v1961_v50 }
  0xf3   : > { %1789 = vmatprep.subr.bf16.mxu0 %v1963_v54 }
  0xf6   : > { %1790 = vmatpush3.bf16.msra.mxu0 %v1963_v54 }
  0xf7   : > { %1747 = vmatprep.subr.bf16.mxu0 %v1980_v39 }
  0xf9   : > { %1792 = vmatmul.mubr.bf16.vlgmr.msra.gmra.mrb[8].mxu0 %v886_v53 }
  0xfa   : > { %1748 = vmatpush3.bf16.msra.mxu0 %v1981_v40 }
  0xfb   : > { %1749 = vmatprep.subr.bf16.mxu0 %v1982_v41 }
  0xfe   : > { %1750 = vmatpush3.bf16.msra.mxu0 %v1983_v42 }
  0xff   : > { %1751 = vmatprep.subr.bf16.mxu0 %v1984_v43 }
 0x102   : > { %1752 = vmatpush3.bf16.msra.mxu0 %v1985_v44 }
 0x1ac   : > { %v1669_v57 = vpop.f32.mrb[0].mxu0 }
 0x1ad   : > { %v1670_v59 = vpop.f32.mrb[1].mxu0 }
 0x1ae   : > { %v1671_v60 = vadd.f32 %v1670_v59, %v1669_v57  ;;  %v1672_v61 = vpop.f32.mrb[2].mxu0 }
 0x1af   : > { %v1673_v62 = vpop.f32.mrb[3].mxu0 }
 0x1b0   : > { %v642_v63 = vadd.f32 %v1671_v60, %v1568_v58  ;;  %v1674_v0 = vadd.f32 %v1673_v62, %v1672_v61 }
 0x1b2   : > { %v655_v1 = vmax.f32 %v642_v63, 0.0  ;;  %v645_v2 = vadd.f32 %v1674_v0, %v1568_v58 }
 0x1b4   : > { %v656_v3 = vmax.f32 %v645_v2, 0.0  ;;  %v1675_v4 = vpop.f32.mrb[4].mxu0  ;;  %v661_v6 = vrot.slane %v655_v1, 1 }
 0x1b5   : > { %v1676_v5 = vpop.f32.mrb[5].mxu0 }
 0x1b6   : > { %v662_v7 = vrot.slane %v656_v3, 1  ;;  %v1677_v8 = vadd.f32 %v1676_v5, %v1675_v4  ;;  %v1678_v9 = vpop.f32.mrb[6].mxu0  ;;  %v669_v10 = vpack.c.bf16 %v656_v3, %v655_v1 }
 0x1b7   : > { %v1679_v11 = vpop.f32.mrb[7].mxu0 }
 0x1b8   : > { %v650_v12 = vadd.f32 %v1677_v8, %v1568_v58  ;;  %v663_v13 = vsel %vm459_vm0, %v661_v6, %v662_v7 }
 0x1ba   : > { %v657_v14 = vmax.f32 %v650_v12, 0.0 }
 0x1bc   : > { %v664_v15 = vrot.slane %v657_v14, 1  ;;  %v671_v22 = vpack.c.bf16 %v657_v14, %v657_v14 }
 0x1be   : > { %v665_v16 = vsel %vm459_vm0, %v662_v7, %v664_v15  ;;  %v672_v20 = vpack.c.bf16 %v664_v15, %v664_v15 }
 0x1bf   : > { %v670_v17 = vpack.c.bf16 %v665_v16, %v663_v13 }
 0x1c1   : > { %840 = vmatprep.mubr.bf16.mxu1 %v670_v17 }
 0x1c2   : > { %841 = vmatmul.mubr.bf16.vlgmr.msra.gmra.mrb[0].mxu1 %v669_v10 }
 0x1c3   : > { %848 = vmatprep.mubr.bf16.mxu1 %v672_v20  ;;  %1720 = vmatpush3.bf16.msra.mxu1 %v1965_v18 }
 0x1c4   : > { %1721 = vmatprep.subr.bf16.mxu1 %v1966_v19 }
 0x1c7   : > { %1722 = vmatpush3.bf16.msra.mxu1 %v1967_v21 }
 0x1c8   : > { %1723 = vmatprep.subr.bf16.mxu1 %v1968_v23  ;;  %v1986_v23 = vld [vmem:[#allocation12 + $0x58] sm:$0xff]  }
 0x1c9   : > { %1753 = vmatprep.subr.bf16.mxu0 %v1986_v23 }
 0x1ca   : > { %849 = vmatmul.mubr.bf16.gmra.mrb[4].mxu1 %v671_v22 }
 0x1cb   : > { %1724 = vmatpush3.bf16.msra.mxu1 %v1969_v24  ;;  %v1987_v24 = vld [vmem:[#allocation12 + $0x18] sm:$0xff]  }
 0x1cc   : > { %v1793_v25 = vpop.f32.mrb[8].mxu0  ;;  %1725 = vmatprep.subr.bf16.mxu1 %v1970_v26  ;;  %1754 = vmatpush3.bf16.msra.mxu0 %v1987_v24  ;;  %v1989_v26 = vld [vmem:[#allocation12 + $0x20] sm:$0xff]  }
 0x1cd   : > { %v972_v27 = vpop.f32.mrb[9].mxu0  ;;  %v981_v3 = vadd.f32 %v1793_v25, %v1602_v48  ;;  %v1988_v25 = vld [vmem:[#allocation12 + $0x60] sm:$0xff]  }
 0x1ce   : > { %v1794_v29 = vpop.f32.mrb[10].mxu0  ;;  %v973_v54 = vadd.f32 %v1602_v48, %v972_v27  ;;  %1755 = vmatprep.subr.bf16.mxu0 %v1988_v25  ;;  %v1990_v27 = vld [vmem:[#allocation12 + $0x68] sm:$0xff]  }
 0x1cf   : > { %v975_v30 = vpop.f32.mrb[11].mxu0  ;;  %1726 = vmatpush3.bf16.msra.mxu1 %v1971_v28  ;;  %v1991_v28 = vld [vmem:[#allocation12 + $0x28] sm:$0xff]   ;;  %v1992_v29 = vld [vmem:[#allocation12 + $0x70] sm:$0xff]  }
 0x1d0   : > { %1727 = vmatprep.subr.bf16.mxu1 %v1972_v31  ;;  %v976_v57 = vadd.f32 %v1602_v48, %v975_v30  ;;  %1756 = vmatpush3.bf16.msra.mxu0 %v1989_v26  ;;  %v1993_v30 = vld [vmem:[#allocation12 + $0x30] sm:$0xff]   ;;  %v1994_v31 = vld [vmem:[#allocation12 + $0x78] sm:$0xff]  }
 0x1d1   : > { %1757 = vmatprep.subr.bf16.mxu0 %v1990_v27 }
 0x1d3   : > { %1728 = vmatpush3.bf16.msra.mxu1 %v1973_v32  ;;  %v1995_v32 = vld [vmem:[#allocation12 + $0x38] sm:$0xff]  }
 0x1d4   : > { %1729 = vmatprep.subr.bf16.mxu1 %v1974_v33  ;;  %1758 = vmatpush3.bf16.msra.mxu0 %v1991_v28 }
 0x1d5   : > { %1759 = vmatprep.subr.bf16.mxu0 %v1992_v29 }
 0x1d7   : > { %1730 = vmatpush3.bf16.msra.mxu1 %v1975_v34  ;;  %v1611_v34 = vld [vmem:[%s2658_s8] ss:$0 sm:$0xff] }
 0x1d8   : > { %1731 = vmatprep.subr.bf16.mxu1 %v1976_v35  ;;  %1760 = vmatpush3.bf16.msra.mxu0 %v1993_v30 }
 0x1d9   : > { %1761 = vmatprep.subr.bf16.mxu0 %v1994_v31 }
 0x1db   : > { %1732 = vmatpush3.bf16.msra.mxu1 %v1977_v36 }
 0x1dc   : > { %1733 = vmatprep.subr.bf16.mxu1 %v1978_v37  ;;  %1762 = vmatpush3.bf16.msra.mxu0 %v1995_v32 }
 0x1df   : > { %1734 = vmatpush3.bf16.msra.mxu1 %v1979_v38 }
 0x1e0   : > { %1795 = vmatprep.subr.bf16.mxu1 %v1980_v39 }
 0x295   : > { %v1697_v45 = vpop.f32.mrb[0].mxu1 }
 0x296   : > { %v1698_v47 = vpop.f32.mrb[1].mxu1 }
 0x297   : > { %v1699_v49 = vadd.f32 %v1698_v47, %v1697_v45  ;;  %v1700_v50 = vpop.f32.mrb[2].mxu1 }
 0x298   : > { %v1701_v51 = vpop.f32.mrb[3].mxu1 }
 0x299   : > { %v843_v52 = vadd.f32 %v1699_v49, %v1585_v46  ;;  %v1702_v53 = vadd.f32 %v1701_v51, %v1700_v50 }
 0x29b   : > { %v856_v55 = vmax.f32 %v843_v52, 0.0  ;;  %v846_v56 = vadd.f32 %v1702_v53, %v1585_v46 }
 0x29d   : > { %v857_v58 = vmax.f32 %v846_v56, 0.0  ;;  %v986_v59 = vadd.f32 %v973_v54, %v856_v55  ;;  %v1703_v60 = vpop.f32.mrb[4].mxu1 }
 0x29e   : > { %v1704_v61 = vpop.f32.mrb[5].mxu1 }
 0x29f   : > { %v989_v62 = vmax.f32 %v986_v59, 0.0  ;;  %v987_v63 = vadd.f32 %v976_v57, %v857_v58  ;;  %v1705_v0 = vadd.f32 %v1704_v61, %v1703_v60  ;;  %v1706_v1 = vpop.f32.mrb[6].mxu1 }
 0x2a0   : > { %v1707_v2 = vpop.f32.mrb[7].mxu1 }
 0x2a1   : > { %v990_v4 = vmax.f32 %v987_v63, 0.0  ;;  %v851_v5 = vadd.f32 %v1705_v0, %v1585_v46  ;;  %v996_v6 = vrot.slane %v989_v62, 2  ;;  %v1396_v7 = vrot.slane %v989_v62, 4 }
 0x2a3   : > { %v997_v8 = vrot.slane %v990_v4, 2  ;;  %v1004_v9 = vpack.c.bf16 %v990_v4, %v989_v62  ;;  %v1397_v10 = vrot.slane %v990_v4, 4  ;;  %v858_v11 = vmax.f32 %v851_v5, 0.0  ;;  %v1628_v62 = vld [vmem:[%s2660_s10] ss:$0 sm:$0xff] }
 0x2a5   : > { %v988_v12 = vadd.f32 %v981_v3, %v858_v11  ;;  %v998_v13 = vsel %vm995_vm1, %v996_v6, %v997_v8  ;;  %v2565_v14 = vsel %vm1395_vm2, %v1396_v7, %v1397_v10 }
 0x2a7   : > { %v2567_v15 = vmax.f32 %v988_v12, 0.0 }
 0x2a9   : > { %v999_v16 = vrot.slane %v2567_v15, 2  ;;  %v1399_v17 = vrot.slane %v2567_v15, 4  ;;  %v1006_v22 = vpack.c.bf16 %v2567_v15, %v2567_v15 }
 0x2ab   : > { %v1000_v18 = vsel %vm995_vm1, %v997_v8, %v999_v16  ;;  %v2574_v19 = vsel %vm1395_vm2, %v1397_v10, %v1399_v17  ;;  %v1007_v21 = vpack.c.bf16 %v999_v16, %v999_v16 }
 0x2ac   : > { %v1005_v20 = vpack.c.bf16 %v1000_v18, %v998_v13 }
 0x2ae   : > { %1175 = vmatprep.mubr.bf16.mxu1 %v1005_v20 }
 0x2af   : > { %1176 = vmatmul.mubr.bf16.vlgmr.msra.gmra.mrb[8].mxu1 %v1004_v9 }
 0x2b0   : > { %1183 = vmatprep.mubr.bf16.mxu1 %v1007_v21  ;;  %1803 = vmatpush3.bf16.msra.mxu1 %v1981_v40 }
 0x2b1   : > { %1796 = vmatprep.subr.bf16.mxu1 %v1982_v41 }
 0x2b4   : > { %1804 = vmatpush3.bf16.msra.mxu1 %v1983_v42 }
 0x2b5   : > { %1797 = vmatprep.subr.bf16.mxu1 %v1984_v43 }
 0x2b7   : > { %1184 = vmatmul.mubr.bf16.gmra.mrb[12].mxu1 %v1006_v22 }
 0x2b8   : > { %1805 = vmatpush3.bf16.msra.mxu1 %v1985_v44 }
 0x2b9   : > { %1798 = vmatprep.subr.bf16.mxu1 %v1986_v23 }
 0x2bc   : > { %1806 = vmatpush3.bf16.msra.mxu1 %v1987_v24 }
 0x2bd   : > { %1799 = vmatprep.subr.bf16.mxu1 %v1988_v25 }
 0x2c0   : > { %1807 = vmatpush3.bf16.msra.mxu1 %v1989_v26 }
 0x2c1   : > { %1800 = vmatprep.subr.bf16.mxu1 %v1990_v27 }
 0x2c4   : > { %1808 = vmatpush3.bf16.msra.mxu1 %v1991_v28 }
 0x2c5   : > { %1801 = vmatprep.subr.bf16.mxu1 %v1992_v29 }
 0x2c8   : > { %1809 = vmatpush3.bf16.msra.mxu1 %v1993_v30 }
 0x2c9   : > { %1802 = vmatprep.subr.bf16.mxu1 %v1994_v31 }
 0x2cc   : > { %1810 = vmatpush3.bf16.msra.mxu1 %v1995_v32 }
 0x382   : > { %v1735_v33 = vpop.f32.mrb[8].mxu1 }
 0x383   : > { %v1736_v35 = vpop.f32.mrb[9].mxu1 }
 0x384   : > { %v1737_v36 = vadd.f32 %v1736_v35, %v1735_v33  ;;  %v1738_v37 = vpop.f32.mrb[10].mxu1 }
 0x385   : > { %v1739_v38 = vpop.f32.mrb[11].mxu1 }
 0x386   : > { %v1178_v39 = vadd.f32 %v1737_v36, %v1611_v34  ;;  %v1740_v40 = vadd.f32 %v1739_v38, %v1738_v37 }
 0x388   : > { %v1191_v41 = vmax.f32 %v1178_v39, 0.0  ;;  %v1181_v42 = vadd.f32 %v1740_v40, %v1611_v34 }
 0x38a   : > { %v1192_v43 = vmax.f32 %v1181_v42, 0.0  ;;  %v1741_v44 = vpop.f32.mrb[12].mxu1  ;;  %v1197_v46 = vrot.slane %v1191_v41, 2 }
 0x38b   : > { %v1742_v45 = vpop.f32.mrb[13].mxu1 }
 0x38c   : > { %v1198_v47 = vrot.slane %v1192_v43, 2  ;;  %v1205_v48 = vpack.c.bf16 %v1192_v43, %v1191_v41  ;;  %v1743_v49 = vadd.f32 %v1742_v45, %v1741_v44  ;;  %v1744_v50 = vpop.f32.mrb[14].mxu1 }
 0x38d   : > { %v1745_v51 = vpop.f32.mrb[15].mxu1 }
 0x38e   : > { %v1186_v52 = vadd.f32 %v1743_v49, %v1611_v34  ;;  %v1199_v53 = vsel %vm995_vm1, %v1197_v46, %v1198_v47 }
 0x390   : > { %v1193_v54 = vmax.f32 %v1186_v52, 0.0 }
 0x392   : > { %v1200_v55 = vrot.slane %v1193_v54, 2  ;;  %v1207_v58 = vpack.c.bf16 %v1193_v54, %v1193_v54 }
 0x394   : > { %v1208_v56 = vpack.c.bf16 %v1200_v55, %v1200_v55  ;;  %v1201_v57 = vsel %vm995_vm1, %v1198_v47, %v1200_v55 }
 0x395   : > { %v1206_v59 = vpack.c.bf16 %v1201_v57, %v1199_v53 }
 0x396   : > { %1384 = vmatprep.mubr.bf16.mxu1 %v1208_v56 }
 0x397   : > { %1376 = vmatprep.mubr.bf16.mxu0 %v1206_v59  ;;  %1385 = vmatmul.mubr.bf16.vlgmr.msra.gmra.mrb[16].mxu1 %v1207_v58 }
 0x398   : > { %1377 = vmatmul.mubr.bf16.vlgmr.msra.gmra.mrb[12].mxu0 %v1205_v48 }
 0x46a   : > { %v1769_v60 = vpop.f32.mrb[16].mxu1 }
 0x46b   : > { %v1763_v61 = vpop.f32.mrb[12].mxu0  ;;  %v1770_v63 = vpop.f32.mrb[17].mxu1 }
 0x46c   : > { %v1771_v0 = vadd.f32 %v1770_v63, %v1769_v60  ;;  %v1764_v1 = vpop.f32.mrb[13].mxu0  ;;  %v1772_v2 = vpop.f32.mrb[18].mxu1 }
 0x46d   : > { %v1765_v3 = vadd.f32 %v1764_v1, %v1763_v61  ;;  %v1766_v4 = vpop.f32.mrb[14].mxu0  ;;  %v1773_v5 = vpop.f32.mrb[19].mxu1 }
 0x46e   : > { %v1387_v6 = vadd.f32 %v1771_v0, %v1628_v62  ;;  %v1767_v7 = vpop.f32.mrb[15].mxu0 }
 0x46f   : > { %v1379_v8 = vadd.f32 %v1765_v3, %v1628_v62  ;;  %v1768_v9 = vadd.f32 %v1767_v7, %v1766_v4 }
 0x470   : > { %v1394_v10 = vmax.f32 %v1387_v6, 0.0 }
 0x471   : > { %v1392_v11 = vmax.f32 %v1379_v8, 0.0  ;;  %v1382_v12 = vadd.f32 %v1768_v9, %v1628_v62 }
 0x472   : > { %v1406_v13 = vadd.f32 %v1399_v17, %v1394_v10 }
 0x473   : > { %v1404_v16 = vadd.f32 %v2565_v14, %v1392_v11  ;;  %v1393_v18 = vmax.f32 %v1382_v12, 0.0 }
 0x474   : > { %v1409_v20 = vmax.f32 %v1406_v13, 0.0 }
 0x475   : > { %v1407_v21 = vmax.f32 %v1404_v16, 0.0  ;;  %v1405_v22 = vadd.f32 %v2574_v19, %v1393_v18 }
 0x476   : > { %1412 = vst [vmem:[%s2542_s15 + $0xe] sm:$0x3] %v1409_v20 }
 0x477   : > { %1410 = vst [vmem:[%s2542_s15 - $0x2] sm:$0xfc] %v1407_v21  ;;  %v1408_v14 = vmax.f32 %v1405_v22, 0.0 }
 0x479   : > { %1411 = vst [vmem:[%s2542_s15 + $0x6] sm:$0xff] %v1408_v14 }
 0x47a   : > { %2174 = shalt.err (!%p2171_p2)
}
 0x47b   : > { %s2175_s12 = scalar_lea.hbm %s2596_s23, 256  ;;  %s2179_s21 = scalar_lea.hbm %s2696_s24, 512 }
 0x47c   : > { %p2176_p3 = scmp.ne.s32.totalorder %s2596_s23, %s2175_s12  ;;  %p2180_p7 = scmp.lt.u32.totalorder %s2596_s23, %s2696_s24 }
 0x47d   : > { %p2181_p9 = scmp.lt.u32.totalorder %s2179_s21, %s2175_s12  ;;  %p2183_p4 = scmp.lt.u32.totalorder %s2175_s12, %s2596_s23 }
 0x47e   : > { %p2177_p5 = pnand %p2176_p3, %p2697_p1 }
 0x47f   : > { %p2182_p12 = por %p2181_p9, %p2180_p7 }
 0x480   : > { %p2178_p6 = pneg %p2177_p5 }
 0x481   : > { %p2184_p13 = por %p2183_p4, %p2182_p12 }
 0x483   : > { %p2185_p8 = pnand %p2184_p13, %p2178_p6 }
 0x485   : > { %2188 = shalt.err (!%p2185_p8)
}
 0x486   : > { %s2264_s3 = smov 128   ;;  %s2265_s27 = smov 8  }
 0x487   : > { %1831 = dma.vmem_to_hbm [thread:$0]  (%p2697_p1), %s2598_s19, 256, %s2596_s23, %s2604_s20, %s2264_s3, %s2264_s3, %s2265_s27  }
 0x488 PF: > { %s2698_s22 = sld [smem:[#allocation26_spill]]  ;;  %s2699_s13 = sld [smem:[#allocation23_spill]] }
 0x489   : > { %s2700_s28 = sld [smem:[#allocation29_spill]] }
 0x48e   : > { %p1863_p10 = scmp.ge.s32.totalorder %s2698_s22, 2  ;;  %s1444_s25 = sand.u32 1, %s2699_s13  }
 0x48f   : > { %p2701_p11 = scmp.ne.s32.totalorder %s2700_s28, 0  ;;  %s1445_s11 = scalar_lea.sflag [#allocation6], %s1444_s25 }
 0x491   : > { %p1850_p0 = pnand %p1863_p10, %p2701_p11 }
 0x493   : > { %2228 = dma.done.wait (!%p1850_p0), %s1445_s11, 256  }
 0x494   : > { %2230 = vsyncadd (!%p1850_p0), %s1445_s11, 4294967040  ;;  %s27_s22 = sadd.s32 1, %s2698_s22   ;;  %s2702_s29 = sld [smem:[#allocation24_spill]] }
 0x495   : > { %p24_p2 = scmp.ge.s32.totalorder %s27_s22, 4   ;;  %s2703_s19 = sld [smem:[#allocation30_spill]] }
 0x496   : > { %s2704_s20 = sld [smem:[#allocation25_spill]]  ;;  %s2705_s21 = sld [smem:[#allocation27_spill]] }
 0x497   : > { %s2706_s17 = smov %s2237_s18  ;;  %26 = sbr.rel (!%p24_p2) target bundleno = 10 (0xa), region = 118 }
 0x49a   : > { %s2707_s18 = smov %s2702_s29 }
 0x49e   :  { %1450 = vsyncpa [#allocation5], 1 }
 0x49f   :  { %1452 = vsyncpa [#allocation5 + $0x1], 1 }
 0x4a0   :  { %1453 = vsyncpa [#allocation8], 1 }
 0x4a1   :  { %1454 = vsyncpa [#allocation11], 1 }
 0x4a2   :  { %1455 = vsyncpa [#allocation6], 1 }
 0x4a3   :  { %1457 = vsyncpa [#allocation6 + $0x1], 1 }
 0x4a4   :  { %1458 = vsyncmov [#allocation3] }
 0x4a7   :  { %s1459_s23 = vpop.sfrf %1458 }
 0x4a8   :  { %p1650_p1 = scmp.ne.s32.totalorder %s1459_s23, 0 }
 0x4aa   :  { %1463 = shalt.err (%p1650_p1)  }

</bundles_post_ra>
